<compile_context>
chip_gen: v5e
topology: v5e:2x2
jax: 0.10.0
libtpu: 0.0.40
codegen_flags: <defaults>
</compile_context>

<pallas_src>
import functools

import jax
import jax.numpy as jnp
from jax import lax
from jax.experimental import pallas as pl
from jax.experimental.pallas import tpu as pltpu


# ----------------------------------------------------------------------------
# Generation-aware VMEM budget.
# ----------------------------------------------------------------------------
def _vmem_budget():
    """Returns (scoped_vmem_limit_bytes, per_input_buffer_tile_bytes)."""
    vmem_phys = 128 << 20
    try:
        info = pltpu.get_tpu_info()
        cap = getattr(info, "vmem_capacity_bytes", None)
        if cap:
            vmem_phys = int(cap)
    except Exception:
        pass
    if vmem_phys <= (64 << 20):
        # v7x-class: 64 MiB physical VMEM, ~3.2 TB/s HBM -> larger tiles to
        # amortise per-step overhead, but leave headroom under 64 MiB.
        return 48 << 20, 12 << 20
    # v5e / v6e: 128 MiB physical VMEM.
    return 32 << 20, 8 << 20


# ----------------------------------------------------------------------------
# Shared epilogue: fold a (ROWS, 1) f32 contribution column into the (8, 1)
# accumulator with VALU-only adds (the reshape is a pure vreg reinterpretation).
# ----------------------------------------------------------------------------
def _accumulate(acc_ref, contrib):
    rows = contrib.shape[0]
    acc_ref[...] += jnp.sum(contrib.reshape(rows // 8, 8, 1), axis=0)


# ----------------------------------------------------------------------------
# Streaming kernel: one grid step reads a (ROWS, V) tile of token rows.
# ----------------------------------------------------------------------------
def _ce_stream_kernel(x_ref, tgt_ref, msk_ref, out_ref, acc_ref, *,
                      tiles_per_core, n_rows):
    c = pl.program_id(0)          # parallel axis (TensorCore on v7x)
    i = pl.program_id(1)          # arbitrary (reduction) axis
    tile = c * tiles_per_core + i  # un-clamped global tile index
    rows, v = x_ref.shape

    @pl.when(i == 0)
    def _init():
        acc_ref[...] = jnp.zeros_like(acc_ref)

    x = x_ref[...]                                    # (ROWS, V) native dtype
    tgt = tgt_ref[...]                                # (ROWS, 1) int32
    msk = msk_ref[...]                                # (ROWS, 1) f32

    # One-hot gather along the vocab (lane) axis; exact in native dtype since
    # each row has a single non-zero, then cast the narrow column to f32.
    col_ids = lax.broadcasted_iota(jnp.int32, (1, v), 1)
    picked = jnp.where(col_ids == tgt, x, jnp.zeros((), x.dtype))
    gathered = jnp.sum(picked, axis=1, keepdims=True).astype(jnp.float32)

    # Rows past n_rows (ragged last tile / clamped duplicate tile on the
    # padded parallel split) must contribute exactly zero and must not leak
    # NaNs from unspecified padding -> select.
    row_ids = tile * rows + lax.broadcasted_iota(jnp.int32, (rows, 1), 0)
    contrib = jnp.where(row_ids < n_rows, -gathered * msk, 0.0)
    _accumulate(acc_ref, contrib)

    @pl.when(i == tiles_per_core - 1)
    def _finalize():
        out_ref[...] = jnp.sum(acc_ref[...], axis=0, keepdims=True)


def _cross_entropy_stream(x, tgt2, msk2, n_rows, v, itemsize, sub, block_rows):
    vmem_limit, tile_bytes = _vmem_budget()

    if block_rows is None:
        rows = max(sub, min(tile_bytes // max(1, v * itemsize), 2048))
    else:
        rows = max(8, int(block_rows))
    rows = min(rows, n_rows)
    rows = (rows // sub) * sub if rows >= sub else (rows // 8) * 8
    rows = max(8, rows)

    n_tiles = pl.cdiv(n_rows, rows)
    n_par = 2 if n_tiles >= 2 else 1          # both TensorCores on v7x
    tpc = pl.cdiv(n_tiles, n_par)             # tiles per core

    kernel = functools.partial(_ce_stream_kernel,
                               tiles_per_core=tpc, n_rows=n_rows)

    def xmap(c, i):
        # Clamp so the padded tile of the second core never DMAs out of
        # bounds; its contribution is masked to zero in the kernel.
        return (jnp.minimum(c * tpc + i, n_tiles - 1), 0)

    out = pl.pallas_call(
        kernel,
        out_shape=jax.ShapeDtypeStruct((n_par, 1), jnp.float32),
        grid=(n_par, tpc),
        in_specs=[
            pl.BlockSpec((rows, v), xmap),
            pl.BlockSpec((rows, 1), xmap),
            pl.BlockSpec((rows, 1), xmap),
        ],
        out_specs=pl.BlockSpec((1, 1), lambda c, i: (c, 0)),
        scratch_shapes=[pltpu.VMEM((8, 1), jnp.float32)],
        compiler_params=pltpu.CompilerParams(
            dimension_semantics=("parallel", "arbitrary"),
            vmem_limit_bytes=vmem_limit,
        ),
        cost_estimate=pl.CostEstimate(
            flops=2 * n_rows * v,
            transcendentals=0,
            bytes_accessed=n_rows * v * itemsize + 2 * n_rows * 4 + 8),
    )(x, tgt2, msk2)
    return jnp.sum(out)


# ----------------------------------------------------------------------------
# Slab-gather kernel: input stays in HBM; per row, DMA only the SLAB lanes
# containing the target column (targets scalar-prefetched into SMEM).
# ----------------------------------------------------------------------------
def _ce_gather_kernel(tgt_sm, x_hbm, tgt_ref, msk_ref, out_ref,
                      gbuf, sem, acc_ref, *,
                      tiles_per_core, n_rows, v, slab, tr):
    c = pl.program_id(0)
    i = pl.program_id(1)
    tile = c * tiles_per_core + i

    # Issue TR slab DMAs first so the DMA engine is busy while we do the
    # (cheap) scalar bookkeeping below.  All TR descriptors are in flight at
    # once, which amortises per-descriptor latency.
    # TODO(synk): cross-tile double-buffering (P4) of these gather DMAs would
    # also hide the per-tile wait; left single-buffered for robustness.
    @pl.loop(0, tr)
    def _issue(r):
        row = jnp.minimum(tile * tr + r, n_rows - 1)      # clamp ragged rows
        t = tgt_sm[row]
        t = jnp.minimum(jnp.maximum(t, 0), v - 1)         # clamp bad targets
        col = jnp.bitwise_and(t, -slab)                   # (t // slab) * slab
        col = jnp.minimum(col, v - slab)                  # keep slab in-bounds
        if v % slab == 0:
            col = pl.multiple_of(col, slab)
        pltpu.make_async_copy(
            x_hbm.at[pl.ds(row, 1), pl.ds(col, slab)],
            gbuf.at[pl.ds(r, 1), :],
            sem.at[0],
        ).start()

    @pl.when(i == 0)
    def _init():
        acc_ref[...] = jnp.zeros_like(acc_ref)

    # Wait for all TR copies (same-shaped descriptors on the shared sem).
    @pl.loop(0, tr)
    def _wait(r):
        pltpu.make_async_copy(
            x_hbm.at[pl.ds(0, 1), pl.ds(0, slab)],
            gbuf.at[pl.ds(r, 1), :],
            sem.at[0],
        ).wait()

    g = gbuf[...]                                         # (TR, SLAB) native
    tgt = tgt_ref[...]                                    # (TR, 1) int32
    msk = msk_ref[...]                                    # (TR, 1) f32

    # Position of the target inside its gathered slab (same clamps as above).
    tgt_c = jnp.minimum(jnp.maximum(tgt, 0), v - 1)
    col_v = jnp.minimum(jnp.bitwise_and(tgt_c, -slab), v - slab)
    local = tgt_c - col_v                                  # (TR, 1)

    lane_ids = lax.broadcasted_iota(jnp.int32, (1, slab), 1)
    picked = jnp.where(lane_ids == local, g, jnp.zeros((), g.dtype))
    gathered = jnp.sum(picked, axis=1, keepdims=True).astype(jnp.float32)

    row_ids = tile * tr + lax.broadcasted_iota(jnp.int32, (tr, 1), 0)
    contrib = jnp.where(row_ids < n_rows, -gathered * msk, 0.0)
    _accumulate(acc_ref, contrib)

    @pl.when(i == tiles_per_core - 1)
    def _finalize():
        out_ref[...] = jnp.sum(acc_ref[...], axis=0, keepdims=True)


def _cross_entropy_gather(x, tgt1, tgt2, msk2, n_rows, v, slab, itemsize,
                          block_rows):
    vmem_limit, _ = _vmem_budget()

    tr = 256 if block_rows is None else max(8, (int(block_rows) // 8) * 8)
    tr = max(8, min(tr, (n_rows // 8) * 8))

    n_tiles = pl.cdiv(n_rows, tr)
    n_par = 2 if n_tiles >= 2 else 1
    tpc = pl.cdiv(n_tiles, n_par)

    kernel = functools.partial(_ce_gather_kernel, tiles_per_core=tpc,
                               n_rows=n_rows, v=v, slab=slab, tr=tr)

    def bmap(c, i, tgt_sm):
        return (jnp.minimum(c * tpc + i, n_tiles - 1), 0)

    grid_spec = pltpu.PrefetchScalarGridSpec(
        num_scalar_prefetch=1,
        grid=(n_par, tpc),
        in_specs=[
            pl.BlockSpec(memory_space=pl.ANY),       # full (N, V) stays in HBM
            pl.BlockSpec((tr, 1), bmap),             # targets (for lane select)
            pl.BlockSpec((tr, 1), bmap),             # mask
        ],
        out_specs=pl.BlockSpec((1, 1), lambda c, i, tgt_sm: (c, 0)),
        scratch_shapes=[
            pltpu.VMEM((tr, slab), x.dtype),         # gathered slabs
            pltpu.SemaphoreType.DMA((1,)),
            pltpu.VMEM((8, 1), jnp.float32),         # partial-sum accumulator
        ],
    )

    out = pl.pallas_call(
        kernel,
        out_shape=jax.ShapeDtypeStruct((n_par, 1), jnp.float32),
        grid_spec=grid_spec,
        compiler_params=pltpu.CompilerParams(
            dimension_semantics=("parallel", "arbitrary"),
            vmem_limit_bytes=vmem_limit,
        ),
        cost_estimate=pl.CostEstimate(
            flops=2 * n_rows * slab,
            transcendentals=0,
            bytes_accessed=n_rows * (slab * itemsize + 8) + 8),
    )(tgt1, x, tgt2, msk2)
    return jnp.sum(out)


# ----------------------------------------------------------------------------
# Public wrapper.
# ----------------------------------------------------------------------------
def cross_entropy(inp, target, mask, *, block_rows=None, force_gather=None):
    """Pallas-backed equivalent of CrossEntropy.forward.

    inp   : [B, S, V]  (float32 or bfloat16 — kept in its native dtype)
    target: [B, S]     integer class index along V
    mask  : [B, S]     per-token weight
    Returns a scalar float32 loss.
    """
    assert inp.ndim == 3 and target.ndim == 2 and mask.ndim == 2
    B, S, V = inp.shape
    n_rows = B * S

    x = inp.reshape(n_rows, V)
    tgt1 = target.reshape(n_rows).astype(jnp.int32)
    msk1 = mask.reshape(n_rows).astype(jnp.float32)

    itemsize = x.dtype.itemsize
    sub = max(8, 32 // itemsize)          # sublane packing: 8 f32 / 16 bf16 / 32 i8

    # Tiny inputs: pad rows up to 8 so row blocks satisfy the (8, 128) rule.
    # Padded rows carry mask == 0 and input == 0 -> contribute exactly zero.
    if n_rows < 8:
        pad = 8 - n_rows
        x = jnp.pad(x, ((0, pad), (0, 0)))
        tgt1 = jnp.pad(tgt1, (0, pad))
        msk1 = jnp.pad(msk1, (0, pad))
        n_rows = 8

    tgt2 = tgt1.reshape(n_rows, 1)
    msk2 = msk1.reshape(n_rows, 1)

    # Slab gather pays off once a full row is much bigger than one slab DMA
    # (~512 B) plus its descriptor cost, and while the prefetched target array
    # still fits comfortably in SMEM.
    slab = 128 if itemsize >= 4 else 256
    use_gather = (V >= slab
                  and V * itemsize >= 8192
                  and n_rows <= (1 << 17))
    if force_gather is not None:
        use_gather = bool(force_gather) and V >= slab

    if use_gather:
        return _cross_entropy_gather(x, tgt1, tgt2, msk2, n_rows, V, slab,
                                     itemsize, block_rows)
    return _cross_entropy_stream(x, tgt2, msk2, n_rows, V, itemsize, sub,
                                 block_rows)


# ----------------------------------------------------------------------------
# Pure-JAX reference + self-test.
# ----------------------------------------------------------------------------
def _reference(inp, target, mask):
    gathered = jnp.take_along_axis(
        inp.astype(jnp.float32), target[:, :, None].astype(jnp.int32),
        axis=2)[:, :, 0]
    return jnp.sum(-gathered * mask.astype(jnp.float32))


if __name__ == "__main__":
    key = jax.random.PRNGKey(0)

    def run_case(B, S, V, **kw):
        k = jax.random.fold_in(key, B * 10007 + S * 101 + V)
        k1, k2, k3 = jax.random.split(k, 3)
        logp = jax.nn.log_softmax(
            jax.random.normal(k1, (B, S, V), dtype=jnp.float32), axis=-1)
        target = jax.random.randint(k2, (B, S), 0, V, dtype=jnp.int32)
        mask = (jax.random.uniform(k3, (B, S)) > 0.25).astype(jnp.float32)

        got = cross_entropy(logp, target, mask, **kw)
        jax.block_until_ready(got)
        ref = _reference(logp, target, mask)
        assert jnp.allclose(got, ref, rtol=2e-5, atol=2e-5), (B, S, V, kw, got, ref)

    # 1) Small default case (streaming path, single tile).
    run_case(2, 8, 32)
    # 2) Multi-tile streaming + (parallel, arbitrary) grid split + ragged tail.
    run_case(2, 50, 256, block_rows=16, force_gather=False)
    # 3) Slab-gather path: scalar-prefetched targets + per-row 128-lane DMAs.
    run_case(4, 64, 2048, block_rows=64, force_gather=True)

    print("KERNEL_OK")
</pallas_src>

<mosaic_0001>
module attributes {stable_mosaic.version = 11 : i64} {
  func.func @_ce_stream_kernel(%arg0: i32, %arg1: i32, %arg2: memref<16x32xf32, #tpu.memory_space<vmem>>, %arg3: memref<16x1xi32, #tpu.memory_space<vmem>>, %arg4: memref<16x1xf32, #tpu.memory_space<vmem>>, %arg5: memref<1x1xf32, #tpu.memory_space<vmem>>, %arg6: memref<8x1xf32, #tpu.memory_space<vmem>>) attributes {dimension_semantics = [#tpu.dimension_semantics<parallel>, #tpu.dimension_semantics<arbitrary>], iteration_bounds = array<i64: 1, 1>, scalar_prefetch = 0 : i64, scratch_operands = 1 : i64, tpu.core_type = #tpu.core_type<tc>, window_params = [{transform_indices = @transform_0, window_bounds = array<i64: 16, 32>}, {transform_indices = @transform_1, window_bounds = array<i64: 16, 1>}, {transform_indices = @transform_2, window_bounds = array<i64: 16, 1>}, {transform_indices = @transform_3, window_bounds = array<i64: 1, 1>}]} {
    %c1_i32 = arith.constant 1 : i32
    %0 = arith.muli %arg0, %c1_i32 : i32
    %1 = arith.addi %0, %arg1 : i32
    %c0_i32 = arith.constant 0 : i32
    %2 = arith.cmpi eq, %arg1, %c0_i32 : i32
    %3 = arith.extui %2 : i1 to i32
    %c0_i32_0 = arith.constant 0 : i32
    %4 = arith.cmpi ne, %3, %c0_i32_0 : i32
    scf.if %4 {
      %cst_17 = arith.constant 0.000000e+00 : f32
      %35 = vector.broadcast %cst_17 : f32 to vector<8x1xf32>
      %c0_18 = arith.constant 0 : index
      %c0_19 = arith.constant 0 : index
      %36 = vector.load %arg6[%c0_18, %c0_19] : memref<8x1xf32, #tpu.memory_space<vmem>>, vector<8x1xf32>
      tpu.vector_store %arg6[%c0_18, %c0_19], %35 {strides = array<i32>} : memref<8x1xf32, #tpu.memory_space<vmem>>, vector<8x1xf32>,
    } else {
    }
    %c0 = arith.constant 0 : index
    %c0_1 = arith.constant 0 : index
    %5 = vector.load %arg2[%c0, %c0_1] : memref<16x32xf32, #tpu.memory_space<vmem>>, vector<16x32xf32>
    %c0_2 = arith.constant 0 : index
    %c0_3 = arith.constant 0 : index
    %6 = vector.load %arg3[%c0_2, %c0_3] : memref<16x1xi32, #tpu.memory_space<vmem>>, vector<16x1xi32>
    %c0_4 = arith.constant 0 : index
    %c0_5 = arith.constant 0 : index
    %7 = vector.load %arg4[%c0_4, %c0_5] : memref<16x1xf32, #tpu.memory_space<vmem>>, vector<16x1xf32>
    %8 = tpu.iota {dimensions = array<i32: 1>} : vector<1x32xi32>
    %9 = vector.broadcast %8 : vector<1x32xi32> to vector<16x32xi32>
    %10 = vector.broadcast %6 : vector<16x1xi32> to vector<16x32xi32>
    %11 = arith.cmpi eq, %9, %10 : vector<16x32xi32>
    %cst = arith.constant 0.000000e+00 : f32
    %12 = vector.broadcast %cst : f32 to vector<16x32xf32>
    %13 = arith.select %11, %5, %12 : vector<16x32xi1>, vector<16x32xf32>
    %cst_6 = arith.constant dense<0.000000e+00> : vector<16xf32>
    %14 = vector.multi_reduction <add>, %13, %cst_6 [1] : vector<16x32xf32> to vector<16xf32>
    %15 = vector.shape_cast %14 : vector<16xf32> to vector<16x1xf32>
    %c16_i32 = arith.constant 16 : i32
    %16 = arith.muli %1, %c16_i32 : i32
    %17 = tpu.iota {dimensions = array<i32: 0>} : vector<16x1xi32>
    %18 = vector.broadcast %16 : i32 to vector<16x1xi32>
    %19 = arith.addi %18, %17 : vector<16x1xi32>
    %c16_i32_7 = arith.constant 16 : i32
    %20 = vector.broadcast %c16_i32_7 : i32 to vector<16x1xi32>
    %21 = arith.cmpi slt, %19, %20 : vector<16x1xi32>
    %cst_8 = arith.constant 0.000000e+00 : f32
    %22 = vector.broadcast %cst_8 : f32 to vector<16x1xf32>
    %23 = arith.subf %22, %15 : vector<16x1xf32>
    %24 = arith.mulf %23, %7 : vector<16x1xf32>
    %cst_9 = arith.constant 0.000000e+00 : f32
    %25 = vector.broadcast %cst_9 : f32 to vector<16x1xf32>
    %26 = arith.select %21, %24, %25 : vector<16x1xi1>, vector<16x1xf32>
    %c0_10 = arith.constant 0 : index
    %c0_11 = arith.constant 0 : index
    %27 = vector.load %arg6[%c0_10, %c0_11] : memref<8x1xf32, #tpu.memory_space<vmem>>, vector<8x1xf32>
    %28 = vector.shape_cast %26 : vector<16x1xf32> to vector<2x8x1xf32>
    %cst_12 = arith.constant dense<0.000000e+00> : vector<8x1xf32>
    %29 = vector.multi_reduction <add>, %28, %cst_12 [0] : vector<2x8x1xf32> to vector<8x1xf32>
    %30 = arith.addf %27, %29 : vector<8x1xf32>
    %c0_13 = arith.constant 0 : index
    %c0_14 = arith.constant 0 : index
    %31 = vector.load %arg6[%c0_13, %c0_14] : memref<8x1xf32, #tpu.memory_space<vmem>>, vector<8x1xf32>
    tpu.vector_store %arg6[%c0_13, %c0_14], %30 {strides = array<i32>} : memref<8x1xf32, #tpu.memory_space<vmem>>, vector<8x1xf32>,
    %c0_i32_15 = arith.constant 0 : i32
    %32 = arith.cmpi eq, %arg1, %c0_i32_15 : i32
    %33 = arith.extui %32 : i1 to i32
    %c0_i32_16 = arith.constant 0 : i32
    %34 = arith.cmpi ne, %33, %c0_i32_16 : i32
    scf.if %34 {
      %c0_17 = arith.constant 0 : index
      %c0_18 = arith.constant 0 : index
      %35 = vector.load %arg6[%c0_17, %c0_18] : memref<8x1xf32, #tpu.memory_space<vmem>>, vector<8x1xf32>
      %cst_19 = arith.constant dense<0.000000e+00> : vector<1xf32>
      %36 = vector.multi_reduction <add>, %35, %cst_19 [0] : vector<8x1xf32> to vector<1xf32>
      %37 = vector.shape_cast %36 : vector<1xf32> to vector<1x1xf32>
      %c0_20 = arith.constant 0 : index
      %c0_21 = arith.constant 0 : index
      %38 = vector.load %arg5[%c0_20, %c0_21] : memref<1x1xf32, #tpu.memory_space<vmem>>, vector<1x1xf32>
      tpu.vector_store %arg5[%c0_20, %c0_21], %37 {strides = array<i32>} : memref<1x1xf32, #tpu.memory_space<vmem>>, vector<1x1xf32>,
    } else {
    }
    return
  }
  func.func @transform_0(%arg0: i32, %arg1: i32) -> (i32, i32) {
    %c1_i32 = arith.constant 1 : i32
    %0 = arith.muli %arg0, %c1_i32 : i32
    %1 = arith.addi %0, %arg1 : i32
    %c0_i32 = arith.constant 0 : i32
    %2 = arith.minsi %1, %c0_i32 : i32
    %c0_i32_0 = arith.constant 0 : i32
    %c0_i32_1 = arith.constant 0 : i32
    return %2, %c0_i32_0 : i32, i32
  }
  func.func @transform_1(%arg0: i32, %arg1: i32) -> (i32, i32) {
    %c1_i32 = arith.constant 1 : i32
    %0 = arith.muli %arg0, %c1_i32 : i32
    %1 = arith.addi %0, %arg1 : i32
    %c0_i32 = arith.constant 0 : i32
    %2 = arith.minsi %1, %c0_i32 : i32
    %c0_i32_0 = arith.constant 0 : i32
    %c0_i32_1 = arith.constant 0 : i32
    return %2, %c0_i32_0 : i32, i32
  }
  func.func @transform_2(%arg0: i32, %arg1: i32) -> (i32, i32) {
    %c1_i32 = arith.constant 1 : i32
    %0 = arith.muli %arg0, %c1_i32 : i32
    %1 = arith.addi %0, %arg1 : i32
    %c0_i32 = arith.constant 0 : i32
    %2 = arith.minsi %1, %c0_i32 : i32
    %c0_i32_0 = arith.constant 0 : i32
    %c0_i32_1 = arith.constant 0 : i32
    return %2, %c0_i32_0 : i32, i32
  }
  func.func @transform_3(%arg0: i32, %arg1: i32) -> (i32, i32) {
    %c0_i32 = arith.constant 0 : i32
    %c0_i32_0 = arith.constant 0 : i32
    return %arg0, %c0_i32 : i32, i32
  }
}

</mosaic_0001>

<bundles_post_ra>
// kernel: tpu_custom_call.1
= control target key start
LH: loop header
LB: loop body
LE: loop exit
PB: predicated region body
PF: predicated region fallthrough
CT: control target
= control target key end

     0   :  { %s291_s0 = inlined_call_operand.vmem [shape: f32[16,32], index: 0, kind: input, shape index: {}]   ;;  %s292_s1 = inlined_call_operand.vmem [shape: s32[16,1], index: 1, kind: input, shape index: {}]   ;;  %s293_s2 = inlined_call_operand.vmem [shape: f32[16,1], index: 2, kind: input, shape index: {}]   ;;  %s294_s3 = inlined_call_operand.hbm [shape: f32[1,1], index: 3, kind: output, shape index: {}]  }
   0x1   :  { %v120_v0 = vld [vmem:[%s292_s1] sm:$0xff] }
   0x2   :  { %8 = vsyncpa [#allocation4], 0  ;;  %v242_v1 = vmov 0   ;;  %v121_v2 = vld [vmem:[%s292_s1 + $0x8] sm:$0xff]  ;;  %v124_v3 = vlaneseq  ;;  %v118_v5 = vld [vmem:[%s291_s0] sm:$0xff]  ;;  %vm136_vm0 = vcmask 261120  }
   0x3   :  { %215 = vset.pattern.permute.xlu0 %v242_v1  ;;  %v119_v9 = vld [vmem:[%s291_s0 + $0x8] sm:$0xff]  ;;  %vm116_vm3 = vcmask 7168   ;;  %v243_v13 = vmov 0.0   ;;  %v122_v16 = vld [vmem:[%s293_s2] sm:$0xff]  ;;  %s244_s0 = smov [#allocation3]   ;;  %s185_s25 = sshll.u32 %s294_s3, 4  ;;  %s186_s25 = int_to_ptr.hbm [resolvable:$true] %s185_s25 }
   0x4   :  { %127 = vperm.xlu0 %215, %v120_v0   ;;  %v125_v4 = vand.u32 127, %v124_v3  ;;  %117 = vst.msk [vmem:[#allocation2] sm:$0xff] %vm116_vm3, %v243_v13  ;;  %v123_v17 = vld [vmem:[%s293_s2 + $0x8] sm:$0xff]  ;;  %s183_s2 = sshll.u32 %s244_s0, 4  ;;  %vm176_vm4 = vcmask 0   ;;  %s184_s2 = int_to_ptr.vmem [resolvable:$true] %s183_s2 }
   0xb   :  { %v158_v23 = vld [vmem:[#allocation2] sm:$0xff] }
   0xc   :  { %130 = vperm.xlu0 %215, %v121_v2  }
  0x76   :  { %v128_v6 = vpop.permute.xlu0 %127 }
  0x77   :  { %vm132_vm1 = vcmp.eq.s32.totalorder %v125_v4, %v128_v6 }
  0x78   :  { %v134_v7 = vsel %vm132_vm1, %v118_v5, 0.0 }
  0x79   :  { %v137_v8 = vsel %vm136_vm0, %v134_v7, 0.0 }
  0x7a   :  { %138 = vadd.xlane.f32.xlu1 %v137_v8 }
  0x7e   :  { %v131_v10 = vpop.permute.xlu0 %130 }
  0x7f   :  { %vm133_vm2 = vcmp.eq.s32.totalorder %v125_v4, %v131_v10 }
  0x80   :  { %v135_v11 = vsel %vm133_vm2, %v119_v9, 0.0 }
  0x81   :  { %v140_v12 = vsel %vm136_vm0, %v135_v11, 0.0 }
  0x82   :  { %141 = vadd.xlane.f32.xlu1 %v140_v12 }
  0xed   :  { %v139_v14 = vpop.xlane.xlu1 %138 }
  0xee   :  { %v152_v15 = vsub.f32 0.0, %v139_v14 }
  0xf0   :  { %v154_v19 = vmul.f32 %v152_v15, %v122_v16 }
  0xf2   :  { %v160_v22 = vsel %vm116_vm3, %v154_v19, 0.0 }
  0xf5   :  { %v142_v18 = vpop.xlane.xlu1 %141 }
  0xf6   :  { %v153_v20 = vsub.f32 0.0, %v142_v18 }
  0xf8   :  { %v155_v21 = vmul.f32 %v153_v20, %v123_v17 }
  0xfa   :  { %v161_v24 = vsel %vm116_vm3, %v155_v21, 0.0 }
  0xfb   :  { %v162_v25 = vadd.f32 %v161_v24, %v160_v22 }
  0xfd   :  { %v163_v26 = vadd.f32 %v162_v25, %v158_v23 }
  0xff   :  { %164 = vst.msk [vmem:[#allocation2] sm:$0xff] %vm116_vm3, %v163_v26 }
 0x106   :  { %v168_v27 = vld [vmem:[#allocation2] sm:$0xff] }
 0x107   :  { %v169_v28 = vsel %vm116_vm3, %v168_v27, 0.0 }
 0x108   :  { %v170_v29 = vrot.slane %v169_v28, 4 }
 0x10a   :  { %v171_v30 = vadd.f32 %v170_v29, %v169_v28 }
 0x10c   :  { %v172_v31 = vrot.slane %v171_v30, 2 }
 0x10e   :  { %v173_v32 = vadd.f32 %v172_v31, %v171_v30 }
 0x110   :  { %v174_v33 = vrot.slane %v173_v32, 1 }
 0x112   :  { %v175_v34 = vadd.f32 %v174_v33, %v173_v32 }
 0x114   :  { %177 = vst.msk [vmem:[#allocation3] sm:$0x1] %vm176_vm4, %v175_v34 }
 0x115   :  { %188 = dma.vmem_to_hbm [thread:$0]  %s184_s2, 16, %s186_s25, [#allocation4]  }
 0x116   :  { %240 = dma.done.wait [#allocation4], 16  }
 0x117   :  { %241 = vsyncadd [#allocation4], 4294967280 }
 0x118   :  { %193 = vsyncpa [#allocation4], 1 }

</bundles_post_ra>
